<compile_context>
chip_gen: v7x
topology: tpu7x:2x2x1
jax: 0.10.0
libtpu: 0.0.40
codegen_flags: <defaults>
</compile_context>

<pallas_src>
import jax
import jax.numpy as jnp
from jax import lax
from jax.experimental import pallas as pl
from jax.experimental.pallas import tpu as pltpu


def _make_self_attention_kernel(mxu_dtype):
    """Builds the kernel; mxu_dtype=None feeds the MXU at native dtype."""

    def kernel(q_ref, vals_ref, w1_ref, b1_ref, vw_ref, vb_ref,
               ctx_ref, score_ref, denom_acc, ctx_acc):
        # Per grid step (bb batch elements x one TS sequence tile):
        #   q_ref    : (bb, TS, D_in)    vals_ref : (bb, TS, D_v)
        #   w1_ref   : (H, D_in)         b1_ref   : (1, H)      (torch layouts)
        #   vw_ref   : (1, H)            vb_ref   : (1, 1)
        #   ctx_ref  : (bb, 1, D_v)      score_ref: (bb, 1, TS)  (lane-dense)
        #   denom_acc: (bb, 1, 1) f32    ctx_acc  : (bb, 1, D_v) f32
        s_idx = pl.program_id(1)

        @pl.when(s_idx == 0)
        def _init():
            denom_acc[...] = jnp.zeros_like(denom_acc)
            ctx_acc[...] = jnp.zeros_like(ctx_acc)

        bb, ts, d_in = q_ref.shape
        h_units = w1_ref.shape[0]

        q = q_ref[...]
        w1 = w1_ref[...]
        if mxu_dtype is not None:
            q = q.astype(mxu_dtype)
            w1 = w1.astype(mxu_dtype)

        # W1 linear: fold (bb, TS) into the MXU M dim; contract D_in directly
        # against the torch (H, D_in) layout (== q @ W1.T), f32 accumulator.
        q2 = q.reshape(bb * ts, d_in)
        h2 = lax.dot_general(q2, w1, (((1,), (1,)), ((), ())),
                             preferred_element_type=jnp.float32)      # (bb*TS, H)
        h2 = jnp.tanh(h2 + b1_ref[...].astype(jnp.float32))           # f32 VPU/EUP
        h3 = h2.reshape(bb, ts, h_units)                              # (bb, TS, H)

        # V linear (out_features == 1) as a batched MXU matmul so the logits
        # come out lane-dense along the sequence dim: (bb, 1, TS).
        vw_row = vw_ref[...].astype(jnp.float32).reshape(1, 1, h_units)
        vw_b = jnp.broadcast_to(vw_row, (bb, 1, h_units))
        lhs, rhs = vw_b, h3
        if mxu_dtype is not None:
            lhs = lhs.astype(mxu_dtype)
            rhs = rhs.astype(mxu_dtype)
        logit = jnp.einsum('bqh,bsh->bqs', lhs, rhs,
                           preferred_element_type=jnp.float32)        # (bb, 1, TS)
        logit = logit + vb_ref[...].astype(jnp.float32)
        score = 1.0 / (1.0 + jnp.exp(-logit))                         # sigmoid, f32

        # Lane-dense score tile store (no masked single-lane partial stores).
        score_ref[...] = score.astype(score_ref.dtype)

        # Exact normalizer: plain positive sum, accumulated across S tiles.
        denom_acc[...] += jnp.sum(score, axis=-1, keepdims=True)      # (bb, 1, 1)

        # Unnormalized context on the MXU: (1 x TS) @ (TS x D_v) per batch.
        vals = vals_ref[...]
        sc = score
        if mxu_dtype is not None:
            vals = vals.astype(mxu_dtype)
            sc = sc.astype(mxu_dtype)
        ctx_acc[...] += jnp.einsum('bqs,bsd->bqd', sc, vals,
                                   preferred_element_type=jnp.float32)  # (bb,1,Dv)

        @pl.when(s_idx == pl.num_programs(1) - 1)
        def _finalize():
            d = denom_acc[...]
            inv = pl.reciprocal(d, approx=True)       # EUP vrcp
            inv = inv * (2.0 - d * inv)               # one Newton step -> ~f32
            ctx_ref[...] = (ctx_acc[...] * inv).astype(ctx_ref.dtype)

    return kernel


def _largest_divisor_leq(n, cap):
    cap = max(1, min(cap, n))
    for d in range(cap, 0, -1):
        if n % d == 0:
            return d
    return 1


def _pick_batch_block(batch, target=8):
    bb = _largest_divisor_leq(batch, target)
    # Keep >= 2 steps on the parallel axis when possible (v7x: 2 TensorCores).
    if batch > 1 and batch // bb < 2:
        bb = _largest_divisor_leq(batch, batch // 2)
    return bb


def _pick_seq_block(seq, target=512):
    if seq <= target:
        return seq
    for d in range(target, 0, -1):
        if seq % d == 0 and d % 128 == 0:   # lane-dense score tiles
            return d
    return seq


def self_attention_forward(query, values, w1, b1, vw, vb, *, mxu_dtype=None,
                           batch_block=8, seq_block=None):
    """Pallas forward of the PyTorch SelfAttention module.

    query : (B, S, D_in)      values: (B, S, D_v)
    w1    : (H, D_in)   torch nn.Linear(in_units, out_units).weight
    b1    : (H,)        its bias
    vw    : (1, H)      torch nn.Linear(out_units, 1).weight
    vb    : (1,)        its bias
    mxu_dtype : None (native) or e.g. jnp.bfloat16 to feed the MXU bf16
                operands with f32 accumulation (v6e/v7x full-rate path).
    Returns (context_vector (B, D_v), score (B, S, 1)) like the torch module.
    """
    B, S, d_in = query.shape
    d_v = values.shape[-1]
    H = w1.shape[0]

    # Metadata-only reshapes (no transposes -> no extra HBM round-trips).
    b1_2d = b1.reshape(1, H)
    vb_2d = vb.reshape(1, 1)

    bb = _pick_batch_block(B, batch_block)
    ts = _pick_seq_block(S) if seq_block is None else seq_block
    assert B % bb == 0 and S % ts == 0

    itemsize = jnp.dtype(query.dtype).itemsize
    # Explicit VMEM budget: double-buffered streamed inputs + resident params
    # + outputs + scratch (v5e default scoped limit is 16 MiB; v7x phys 64 MiB).
    est = (2 * 2 * bb * ts * (d_in + d_v) * itemsize
           + 2 * (H * d_in + 3 * H + 4) * itemsize
           + 2 * (bb * d_v + bb * ts) * itemsize
           + 4 * bb * (d_v + 1) * 4
           + (2 << 20))
    vmem_limit = int(min(64 * 2 ** 20, max(32 * 2 ** 20, est)))

    flops = B * (2 * S * d_in * H      # W1 matmul
                 + 2 * S * H           # V projection matmul
                 + 2 * S * d_v)        # context matmul
    bytes_accessed = ((query.size + values.size + w1.size + b1.size
                       + vw.size + vb.size) * itemsize
                      + (B * d_v + B * S) * itemsize)

    ctx3, score3 = pl.pallas_call(
        _make_self_attention_kernel(mxu_dtype),
        out_shape=(jax.ShapeDtypeStruct((B, 1, d_v), query.dtype),
                   jax.ShapeDtypeStruct((B, 1, S), query.dtype)),
        grid=(B // bb, S // ts),
        in_specs=[
            pl.BlockSpec((bb, ts, d_in), lambda b, s: (b, s, 0)),   # query
            pl.BlockSpec((bb, ts, d_v), lambda b, s: (b, s, 0)),    # values
            pl.BlockSpec((H, d_in), lambda b, s: (0, 0)),           # W1 (resident)
            pl.BlockSpec((1, H), lambda b, s: (0, 0)),              # b1 (resident)
            pl.BlockSpec((1, H), lambda b, s: (0, 0)),              # V weight
            pl.BlockSpec((1, 1), lambda b, s: (0, 0)),              # V bias
        ],
        out_specs=(
            pl.BlockSpec((bb, 1, d_v), lambda b, s: (b, 0, 0)),     # context (acc)
            pl.BlockSpec((bb, 1, ts), lambda b, s: (b, 0, s)),      # score (dense)
        ),
        scratch_shapes=[pltpu.VMEM((bb, 1, 1), jnp.float32),        # denom acc
                        pltpu.VMEM((bb, 1, d_v), jnp.float32)],     # ctx acc
        compiler_params=pltpu.CompilerParams(
            dimension_semantics=("parallel", "arbitrary"),
            vmem_limit_bytes=vmem_limit),
        cost_estimate=pl.CostEstimate(
            flops=flops,
            transcendentals=B * S * (H + 1),       # tanh + sigmoid exp
            bytes_accessed=bytes_accessed),
    )(query, values, w1, b1_2d, vw, vb_2d)

    # Metadata-only reshapes back to the torch module's output shapes.
    return ctx3.reshape(B, d_v), score3.reshape(B, S, 1)


def _reference_forward(query, values, w1, b1, vw, vb):
    # Pure-JAX reference mirroring the PyTorch module.
    h = jnp.tanh(query @ w1.T + b1)                               # (B, S, H)
    score = jax.nn.sigmoid(h @ vw.T + vb)                         # (B, S, 1)
    attn = score / jnp.sum(score, axis=1, keepdims=True)          # (B, S, 1)
    ctx = jnp.sum(attn * values, axis=1)                          # (B, D_v)
    return ctx, score


if __name__ == "__main__":
    # Small shapes consistent with SelfAttention(in_units, out_units):
    # query (B, S, in_units), values (B, S, D_v).
    B, S, IN_UNITS, OUT_UNITS = 2, 8, 32, 32
    D_V = IN_UNITS

    key = jax.random.PRNGKey(0)
    k_q, k_v, k_w1, k_b1, k_vw, k_vb = jax.random.split(key, 6)

    query = jax.random.normal(k_q, (B, S, IN_UNITS), dtype=jnp.float32)
    values = jax.random.normal(k_v, (B, S, D_V), dtype=jnp.float32)
    # torch nn.Linear layouts: weight is (out_features, in_features).
    w1 = jax.random.normal(k_w1, (OUT_UNITS, IN_UNITS), dtype=jnp.float32) * 0.1
    b1 = jax.random.normal(k_b1, (OUT_UNITS,), dtype=jnp.float32) * 0.1
    vw = jax.random.normal(k_vw, (1, OUT_UNITS), dtype=jnp.float32) * 0.1
    vb = jax.random.normal(k_vb, (1,), dtype=jnp.float32) * 0.1

    ref_ctx, ref_score = _reference_forward(query, values, w1, b1, vw, vb)

    # Native-dtype (f32) path: exact to the reference.
    ctx, score = self_attention_forward(query, values, w1, b1, vw, vb)
    jax.block_until_ready((ctx, score))
    assert ctx.shape == (B, D_V) and score.shape == (B, S, 1)
    assert jnp.allclose(score, ref_score, atol=1e-5, rtol=1e-5), "score mismatch"
    assert jnp.allclose(ctx, ref_ctx, atol=1e-5, rtol=1e-5), "context mismatch"

    # bf16-at-the-MXU path (v6e/v7x throughput mode); looser, dtype-aware check.
    ctx_bf, score_bf = self_attention_forward(query, values, w1, b1, vw, vb,
                                              mxu_dtype=jnp.bfloat16)
    jax.block_until_ready((ctx_bf, score_bf))
    assert jnp.allclose(score_bf, ref_score, atol=2e-2, rtol=2e-2), \
        "bf16 score mismatch"
    assert jnp.allclose(ctx_bf, ref_ctx, atol=2e-2, rtol=2e-2), \
        "bf16 context mismatch"

    print("KERNEL_OK")
</pallas_src>

<mosaic_0001>
module attributes {stable_mosaic.version = 11 : i64} {
  func.func @kernel(%arg0: i32, %arg1: i32, %arg2: memref<1x8x32xf32, #tpu.memory_space<vmem>>, %arg3: memref<1x8x32xf32, #tpu.memory_space<vmem>>, %arg4: memref<32x32xf32, #tpu.memory_space<vmem>>, %arg5: memref<1x32xf32, #tpu.memory_space<vmem>>, %arg6: memref<1x32xf32, #tpu.memory_space<vmem>>, %arg7: memref<1x1xf32, #tpu.memory_space<vmem>>, %arg8: memref<1x1x32xf32, #tpu.memory_space<vmem>>, %arg9: memref<1x1x8xf32, #tpu.memory_space<vmem>>, %arg10: memref<1x1x1xf32, #tpu.memory_space<vmem>>, %arg11: memref<1x1x32xf32, #tpu.memory_space<vmem>>) attributes {dimension_semantics = [#tpu.dimension_semantics<parallel>, #tpu.dimension_semantics<arbitrary>], iteration_bounds = array<i64: 2, 1>, scalar_prefetch = 0 : i64, scratch_operands = 2 : i64, tpu.core_type = #tpu.core_type<tc>, window_params = [{transform_indices = @transform_0, window_bounds = array<i64: 1, 8, 32>}, {transform_indices = @transform_1, window_bounds = array<i64: 1, 8, 32>}, {pipeline_mode = #tpu.pipeline_mode<synchronous>, transform_indices = @transform_2, window_bounds = array<i64: 32, 32>}, {pipeline_mode = #tpu.pipeline_mode<synchronous>, transform_indices = @transform_3, window_bounds = array<i64: 1, 32>}, {pipeline_mode = #tpu.pipeline_mode<synchronous>, transform_indices = @transform_4, window_bounds = array<i64: 1, 32>}, {pipeline_mode = #tpu.pipeline_mode<synchronous>, transform_indices = @transform_5, window_bounds = array<i64: 1, 1>}, {transform_indices = @transform_6, window_bounds = array<i64: 1, 1, 32>}, {transform_indices = @transform_7, window_bounds = array<i64: 1, 1, 8>}]} {
    %c0_i32 = arith.constant 0 : i32
    %0 = arith.cmpi eq, %arg1, %c0_i32 : i32
    %1 = arith.extui %0 : i1 to i32
    %c0_i32_0 = arith.constant 0 : i32
    %2 = arith.cmpi ne, %1, %c0_i32_0 : i32
    scf.if %2 {
      %cst_37 = arith.constant 0.000000e+00 : f32
      %40 = vector.broadcast %cst_37 : f32 to vector<1x1x1xf32>
      %c0_38 = arith.constant 0 : index
      %c0_39 = arith.constant 0 : index
      %c0_40 = arith.constant 0 : index
      %41 = vector.load %arg10[%c0_38, %c0_39, %c0_40] : memref<1x1x1xf32, #tpu.memory_space<vmem>>, vector<1x1x1xf32>
      tpu.vector_store %arg10[%c0_38, %c0_39, %c0_40], %40 {strides = array<i32>} : memref<1x1x1xf32, #tpu.memory_space<vmem>>, vector<1x1x1xf32>,
      %cst_41 = arith.constant 0.000000e+00 : f32
      %42 = vector.broadcast %cst_41 : f32 to vector<1x1x32xf32>
      %c0_42 = arith.constant 0 : index
      %c0_43 = arith.constant 0 : index
      %c0_44 = arith.constant 0 : index
      %43 = vector.load %arg11[%c0_42, %c0_43, %c0_44] : memref<1x1x32xf32, #tpu.memory_space<vmem>>, vector<1x1x32xf32>
      tpu.vector_store %arg11[%c0_42, %c0_43, %c0_44], %42 {strides = array<i32>} : memref<1x1x32xf32, #tpu.memory_space<vmem>>, vector<1x1x32xf32>,
    } else {
    }
    %c0 = arith.constant 0 : index
    %c0_1 = arith.constant 0 : index
    %c0_2 = arith.constant 0 : index
    %3 = vector.load %arg2[%c0, %c0_1, %c0_2] : memref<1x8x32xf32, #tpu.memory_space<vmem>>, vector<1x8x32xf32>
    %c0_3 = arith.constant 0 : index
    %c0_4 = arith.constant 0 : index
    %4 = vector.load %arg4[%c0_3, %c0_4] : memref<32x32xf32, #tpu.memory_space<vmem>>, vector<32x32xf32>
    %5 = vector.shape_cast %3 : vector<1x8x32xf32> to vector<8x32xf32>
    %cst = arith.constant dense<0.000000e+00> : vector<8x32xf32>
    %6 = tpu.matmul %5, %4, %cst {dimension_numbers = #tpu.dot_dimension_numbers<[1], [1], [0], [0], [0, 0, 1, 0], [], []>} : vector<8x32xf32>, vector<32x32xf32>, vector<8x32xf32> -> vector<8x32xf32>
    %c0_5 = arith.constant 0 : index
    %c0_6 = arith.constant 0 : index
    %7 = vector.load %arg5[%c0_5, %c0_6] : memref<1x32xf32, #tpu.memory_space<vmem>>, vector<1x32xf32>
    %8 = vector.broadcast %7 : vector<1x32xf32> to vector<8x32xf32>
    %9 = arith.addf %6, %8 : vector<8x32xf32>
    %10 = math.tanh %9 : vector<8x32xf32>
    %11 = vector.shape_cast %10 : vector<8x32xf32> to vector<1x8x32xf32>
    %c0_7 = arith.constant 0 : index
    %c0_8 = arith.constant 0 : index
    %12 = vector.load %arg6[%c0_7, %c0_8] : memref<1x32xf32, #tpu.memory_space<vmem>>, vector<1x32xf32>
    %13 = vector.shape_cast %12 : vector<1x32xf32> to vector<1x1x32xf32>
    "tpu.trace_start"() <{level = 10 : i32, message = "bqh,bsh->bqs"}> : () -> ()
    %cst_9 = arith.constant dense<0.000000e+00> : vector<1x1x8xf32>
    %14 = tpu.matmul %13, %11, %cst_9 {dimension_numbers = #tpu.dot_dimension_numbers<[2], [2], [1], [1], [0, 0, 0, 1, 1, 1], [0], [0]>} : vector<1x1x32xf32>, vector<1x8x32xf32>, vector<1x1x8xf32> -> vector<1x1x8xf32>
    "tpu.trace_stop"() : () -> ()
    %c0_10 = arith.constant 0 : index
    %c0_11 = arith.constant 0 : index
    %15 = vector.load %arg7[%c0_10, %c0_11] : memref<1x1xf32, #tpu.memory_space<vmem>>, vector<1x1xf32>
    %16 = vector.shape_cast %15 : vector<1x1xf32> to vector<1x1x1xf32>
    %17 = vector.broadcast %16 : vector<1x1x1xf32> to vector<1x1x8xf32>
    %18 = arith.addf %14, %17 : vector<1x1x8xf32>
    %cst_12 = arith.constant 0.000000e+00 : f32
    %19 = vector.broadcast %cst_12 : f32 to vector<1x1x8xf32>
    %20 = arith.subf %19, %18 : vector<1x1x8xf32>
    %21 = math.exp %20 : vector<1x1x8xf32>
    %cst_13 = arith.constant 1.000000e+00 : f32
    %22 = vector.broadcast %cst_13 : f32 to vector<1x1x8xf32>
    %23 = arith.addf %22, %21 : vector<1x1x8xf32>
    %cst_14 = arith.constant 1.000000e+00 : f32
    %24 = vector.broadcast %cst_14 : f32 to vector<1x1x8xf32>
    %25 = arith.divf %24, %23 : vector<1x1x8xf32>
    %c0_15 = arith.constant 0 : index
    %c0_16 = arith.constant 0 : index
    %c0_17 = arith.constant 0 : index
    %26 = vector.load %arg9[%c0_15, %c0_16, %c0_17] : memref<1x1x8xf32, #tpu.memory_space<vmem>>, vector<1x1x8xf32>
    tpu.vector_store %arg9[%c0_15, %c0_16, %c0_17], %25 {strides = array<i32>} : memref<1x1x8xf32, #tpu.memory_space<vmem>>, vector<1x1x8xf32>,
    %c0_18 = arith.constant 0 : index
    %c0_19 = arith.constant 0 : index
    %c0_20 = arith.constant 0 : index
    %27 = vector.load %arg10[%c0_18, %c0_19, %c0_20] : memref<1x1x1xf32, #tpu.memory_space<vmem>>, vector<1x1x1xf32>
    %cst_21 = arith.constant dense<0.000000e+00> : vector<1x1xf32>
    %28 = vector.multi_reduction <add>, %25, %cst_21 [2] : vector<1x1x8xf32> to vector<1x1xf32>
    %29 = vector.shape_cast %28 : vector<1x1xf32> to vector<1x1x1xf32>
    %30 = arith.addf %27, %29 : vector<1x1x1xf32>
    %c0_22 = arith.constant 0 : index
    %c0_23 = arith.constant 0 : index
    %c0_24 = arith.constant 0 : index
    %31 = vector.load %arg10[%c0_22, %c0_23, %c0_24] : memref<1x1x1xf32, #tpu.memory_space<vmem>>, vector<1x1x1xf32>
    tpu.vector_store %arg10[%c0_22, %c0_23, %c0_24], %30 {strides = array<i32>} : memref<1x1x1xf32, #tpu.memory_space<vmem>>, vector<1x1x1xf32>,
    %c0_25 = arith.constant 0 : index
    %c0_26 = arith.constant 0 : index
    %c0_27 = arith.constant 0 : index
    %32 = vector.load %arg3[%c0_25, %c0_26, %c0_27] : memref<1x8x32xf32, #tpu.memory_space<vmem>>, vector<1x8x32xf32>
    %c0_28 = arith.constant 0 : index
    %c0_29 = arith.constant 0 : index
    %c0_30 = arith.constant 0 : index
    %33 = vector.load %arg11[%c0_28, %c0_29, %c0_30] : memref<1x1x32xf32, #tpu.memory_space<vmem>>, vector<1x1x32xf32>
    "tpu.trace_start"() <{level = 10 : i32, message = "bqs,bsd->bqd"}> : () -> ()
    %cst_31 = arith.constant dense<0.000000e+00> : vector<1x1x32xf32>
    %34 = tpu.matmul %25, %32, %cst_31 {dimension_numbers = #tpu.dot_dimension_numbers<[2], [1], [1], [2], [0, 0, 0, 1, 1, 2], [0], [0]>} : vector<1x1x8xf32>, vector<1x8x32xf32>, vector<1x1x32xf32> -> vector<1x1x32xf32>
    "tpu.trace_stop"() : () -> ()
    %35 = arith.addf %33, %34 : vector<1x1x32xf32>
    %c0_32 = arith.constant 0 : index
    %c0_33 = arith.constant 0 : index
    %c0_34 = arith.constant 0 : index
    %36 = vector.load %arg11[%c0_32, %c0_33, %c0_34] : memref<1x1x32xf32, #tpu.memory_space<vmem>>, vector<1x1x32xf32>
    tpu.vector_store %arg11[%c0_32, %c0_33, %c0_34], %35 {strides = array<i32>} : memref<1x1x32xf32, #tpu.memory_space<vmem>>, vector<1x1x32xf32>,
    %c0_i32_35 = arith.constant 0 : i32
    %37 = arith.cmpi eq, %arg1, %c0_i32_35 : i32
    %38 = arith.extui %37 : i1 to i32
    %c0_i32_36 = arith.constant 0 : i32
    %39 = arith.cmpi ne, %38, %c0_i32_36 : i32
    scf.if %39 {
      %c0_37 = arith.constant 0 : index
      %c0_38 = arith.constant 0 : index
      %c0_39 = arith.constant 0 : index
      %40 = vector.load %arg10[%c0_37, %c0_38, %c0_39] : memref<1x1x1xf32, #tpu.memory_space<vmem>>, vector<1x1x1xf32>
      %41 = tpu.reciprocal %40 {approx = true} : vector<1x1x1xf32> -> vector<1x1x1xf32>
      %42 = arith.mulf %40, %41 : vector<1x1x1xf32>
      %cst_40 = arith.constant 2.000000e+00 : f32
      %43 = vector.broadcast %cst_40 : f32 to vector<1x1x1xf32>
      %44 = arith.subf %43, %42 : vector<1x1x1xf32>
      %45 = arith.mulf %41, %44 : vector<1x1x1xf32>
      %c0_41 = arith.constant 0 : index
      %c0_42 = arith.constant 0 : index
      %c0_43 = arith.constant 0 : index
      %46 = vector.load %arg11[%c0_41, %c0_42, %c0_43] : memref<1x1x32xf32, #tpu.memory_space<vmem>>, vector<1x1x32xf32>
      %47 = vector.broadcast %45 : vector<1x1x1xf32> to vector<1x1x32xf32>
      %48 = arith.mulf %46, %47 : vector<1x1x32xf32>
      %c0_44 = arith.constant 0 : index
      %c0_45 = arith.constant 0 : index
      %c0_46 = arith.constant 0 : index
      %49 = vector.load %arg8[%c0_44, %c0_45, %c0_46] : memref<1x1x32xf32, #tpu.memory_space<vmem>>, vector<1x1x32xf32>
      tpu.vector_store %arg8[%c0_44, %c0_45, %c0_46], %48 {strides = array<i32>} : memref<1x1x32xf32, #tpu.memory_space<vmem>>, vector<1x1x32xf32>,
    } else {
    }
    return
  }
  func.func @transform_0(%arg0: i32, %arg1: i32) -> (i32, i32, i32) {
    %c0_i32 = arith.constant 0 : i32
    %c0_i32_0 = arith.constant 0 : i32
    return %arg0, %arg1, %c0_i32 : i32, i32, i32
  }
  func.func @transform_1(%arg0: i32, %arg1: i32) -> (i32, i32, i32) {
    %c0_i32 = arith.constant 0 : i32
    %c0_i32_0 = arith.constant 0 : i32
    return %arg0, %arg1, %c0_i32 : i32, i32, i32
  }
  func.func @transform_2(%arg0: i32, %arg1: i32) -> (i32, i32) {
    %c0_i32 = arith.constant 0 : i32
    %c0_i32_0 = arith.constant 0 : i32
    %c0_i32_1 = arith.constant 0 : i32
    return %c0_i32, %c0_i32_0 : i32, i32
  }
  func.func @transform_3(%arg0: i32, %arg1: i32) -> (i32, i32) {
    %c0_i32 = arith.constant 0 : i32
    %c0_i32_0 = arith.constant 0 : i32
    %c0_i32_1 = arith.constant 0 : i32
    return %c0_i32, %c0_i32_0 : i32, i32
  }
  func.func @transform_4(%arg0: i32, %arg1: i32) -> (i32, i32) {
    %c0_i32 = arith.constant 0 : i32
    %c0_i32_0 = arith.constant 0 : i32
    %c0_i32_1 = arith.constant 0 : i32
    return %c0_i32, %c0_i32_0 : i32, i32
  }
  func.func @transform_5(%arg0: i32, %arg1: i32) -> (i32, i32) {
    %c0_i32 = arith.constant 0 : i32
    %c0_i32_0 = arith.constant 0 : i32
    %c0_i32_1 = arith.constant 0 : i32
    return %c0_i32, %c0_i32_0 : i32, i32
  }
  func.func @transform_6(%arg0: i32, %arg1: i32) -> (i32, i32, i32) {
    %c0_i32 = arith.constant 0 : i32
    %c0_i32_0 = arith.constant 0 : i32
    %c0_i32_1 = arith.constant 0 : i32
    return %arg0, %c0_i32, %c0_i32_0 : i32, i32, i32
  }
  func.func @transform_7(%arg0: i32, %arg1: i32) -> (i32, i32, i32) {
    %c0_i32 = arith.constant 0 : i32
    %c0_i32_0 = arith.constant 0 : i32
    return %arg0, %c0_i32, %arg1 : i32, i32, i32
  }
}

</mosaic_0001>

<bundles_post_ra>
// kernel: tpu_custom_call.1
= control target key start
LH: loop header
LB: loop body
LE: loop exit
PB: predicated region body
PF: predicated region fallthrough
CT: control target
= control target key end

     0   :  { %s1585_s0 = inlined_call_operand.hbm [shape: f32[2,8,32], index: 0, kind: input, shape index: {}]   ;;  %s1586_s1 = inlined_call_operand.hbm [shape: f32[2,8,32], index: 1, kind: input, shape index: {}]   ;;  %s1587_s2 = inlined_call_operand.hbm [shape: f32[32,32], index: 2, kind: input, shape index: {}]   ;;  %s1588_s3 = inlined_call_operand.vmem [shape: f32[1,32], index: 3, kind: input, shape index: {}]   ;;  %s1589_s4 = inlined_call_operand.vmem [shape: f32[1,32], index: 4, kind: input, shape index: {}]   ;;  %s1590_s5 = inlined_call_operand.<no memory space> [shape: f32[1,1], index: 5, kind: input, shape index: {}]   ;;  %s1591_s6 = inlined_call_operand.hbm [shape: f32[2,1,32], index: 6, kind: output, shape index: {0}]   ;;  %s1592_s7 = inlined_call_operand.hbm [shape: f32[2,1,8], index: 7, kind: output, shape index: {1}]  }
   0x1   :  { %1600 = sst [smem:[#allocation23_spill]] %s1587_s2  ;;  %v13_v0 = vstv %s1590_s5 }
   0x2   :  { %14 = vst [vmem:[#allocation4] sm:$0x1] %v13_v0 }
   0x3   :  { %15 = vsyncpa [#allocation6], 0 }
   0x4   :  { %17 = vsyncpa [#allocation6 + $0x1], 0 }
   0x5   :  { %18 = vsyncpa [#allocation9], 0 }
   0x6   :  { %20 = vsyncpa [#allocation9 + $0x1], 0 }
   0x7   :  { %21 = vsyncpa [#allocation7], 0 }
   0x8   :  { %23 = vsyncpa [#allocation7 + $0x1], 0 }
   0x9   :  { %24 = vsyncpa [#allocation13], 0 }
   0xa   :  { %26 = vsyncpa [#allocation13 + $0x1], 0  ;;  %s1281_s26 = smov 0   ;;  %s1283_s27 = smov 0  }
   0xb   :  { %s1285_s28 = smov 0   ;;  %s1287_s29 = smov 0  }
   0xc   :  { %s1289_s30 = smov 0   ;;  %s1291_s5 = smov 0  }
   0xd LB: > { %1601 = sst [smem:[#allocation19_spill]] %s1213_s28  ;;  %s1312_s8 = sadd.s32 4294967295, %s1225_s5   ;;  %s1225_s5 = sphi %s1291_s5, %s32_s5   ;;  %s1221_s30 = sphi %s1289_s30, %s1624_s30   ;;  %s1217_s29 = sphi %s1287_s29, %s1623_s29   ;;  %s1213_s28 = sphi %s1285_s28, %s1622_s28   ;;  %s1209_s27 = sphi %s1283_s27, %s1626_s27   ;;  %s1205_s26 = sphi %s1281_s26, %s1625_s26  }
   0xe   : > { %1602 = sst [smem:[#allocation20_spill]] %s1221_s30  ;;  %s853_s9 = sadd.s32 4294967294, %s1225_s5  }
   0xf   : > { %p66_p0 = scmp.ne.s32.totalorder %s1209_s27, %s1205_s26  ;;  %p1593_p1 = scmp.eq.s32.totalorder %s1312_s8, 0 }
  0x10   : > { %p208_p3 = scmp.eq.s32.totalorder %s853_s9, 1  ;;  %p854_p5 = scmp.ge.s32.totalorder %s1225_s5, 1 }
  0x11   : > { %p1321_p4 = por %p1593_p1, %p66_p0  ;;  %p243_p7 = scmp.lt.s32.totalorder %s1225_s5, 3 }
  0x12   : > { %p1326_p6 = por %p208_p3, %p66_p0  ;;  %s1227_s13 = smov [#allocation10]  }
  0x13   : > { %s1603_s10 = scalar_select %p1321_p4, 1, 0 }
  0x14   : > { %s1604_s11 = scalar_select %p1326_p6, 1, 0 }
  0x15   : > { %p1331_p8 = pnand %p854_p5, %p243_p7  ;;  %s255_s14 = sshll.u32 %s1227_s13, 4  ;;  %s256_s14 = int_to_ptr.vmem [resolvable:$true] %s255_s14 }
  0x16   : > { %s44_s16 = sadd.s32 1, %s1221_s30  ;;  %s1607_s2 = sld [smem:[#allocation23_spill]] }
  0x17   : > { %s1605_s12 = scalar_select %p1331_p8, 1, 0 }
  0x18   : > { %p928_p9 = pneg %p1331_p8 }
  0x1a   : > { %p1340_p11 = pnand %p928_p9, %p1593_p1 }
  0x1c   : > { %s1015_s19 = scalar_lea.hbm %s1607_s2, 512  ;;  %p1017_p13 = pneg %p1340_p11 }
  0x1d   : > { %p1016_p12 = scmp.ne.s32.totalorder %s1607_s2, %s1015_s19  ;;  %p1022_p5 = scmp.lt.u32.totalorder %s1015_s19, %s1607_s2 }
  0x1f   : > { %p1018_p0 = pnand %p1017_p13, %p1016_p12 }
  0x21   : > { %p1019_p3 = pneg %p1018_p0 }
  0x23   : > { %p1024_p7 = pnand %p1022_p5, %p1019_p3 }
  0x25   : > { %1027 = shalt.err (!%p1024_p7)
}
  0x26   : > { %s1028_s24 = scalar_lea.vmem %s256_s14, 512  ;;  %p1036_p2 = scmp.lt.s32.totalorder %s256_s14, %s256_s14 }
  0x27   : > { %p1029_p9 = scmp.ne.s32.totalorder %s256_s14, %s1028_s24  ;;  %p1037_p6 = scmp.lt.s32.totalorder %s1028_s24, %s1028_s24 }
  0x29   : > { %p1031_p10 = pnand %p1029_p9, %p1017_p13  ;;  %p1038_p4 = por %p1037_p6, %p1036_p2 }
  0x2b   : > { %p1032_p1 = pneg %p1031_p10 }
  0x2d   : > { %p1039_p8 = pnand %p1038_p4, %p1032_p1 }
  0x2f   : > { %1042 = shalt.err (!%p1039_p8)
}
  0x30   : > { %s1228_s25 = smov 128   ;;  %s1229_s9 = smov 8  }
  0x31   : > { %931 = dma.hbm_to_vmem [thread:$0]  (!%p1340_p11), %s1607_s2, 512, %s256_s14, [#allocation9], %s1228_s25, %s1228_s25, %s1229_s9  }
  0x32   : > { %p46_p1 = scmp.ge.s32.totalorder %s44_s16, 2  ;;  %s53_s18 = sadd.s32 1, %s1213_s28 }
  0x33   : > { %p60_p2 = scmp.ne.s32.totalorder %s1213_s28, %s1209_s27  ;;  %p61_p4 = scmp.eq.s32.totalorder %s1225_s5, 0 }
  0x34   : > { %s1628_s16 = smov (%p46_p1, %s44_s16), 0  ;;  %p1610_p8 = scmp.eq.s32.totalorder %s1312_s8, 1 }
  0x35   : > { %1608 = sst [smem:[#allocation21_spill]] %s1628_s16  ;;  %p1367_p6 = por %p61_p4, %p60_p2 }
  0x36   : > { %p1373_p10 = por %p1610_p8, %p60_p2  ;;  %s48_s20 = ssub.s32 %s1221_s30, %s1628_s16 }
  0x37   : > { %p947_p11 = scmp.lt.s32.totalorder %s1225_s5, 2  ;;  %p51_p12 = scmp.eq.s32.totalorder %s48_s20, 0 }
  0x38   : > { %s1611_s15 = scalar_select %p1373_p10, 1, 0 }
  0x39   : > { %s278_s14 = sand.u32 1, %s1213_s28   ;;  %s858_s23 = sshll.u32 %s1221_s30, 7 }
  0x3a   : > { %s1381_s21 = sshll.u32 %s278_s14, 3  ;;  %s1390_s9 = scalar_lea.hbm %s1585_s0, %s858_s23 }
  0x3b   : > { %s1384_s22 = scalar_select %p51_p12, %s1213_s28, %s53_s18  }
  0x3c   : > { %s282_s13 = scalar_lea.vmem [#allocation5], %s1381_s21  ;;  %p1397_p13 = pnand %p947_p11, %p1367_p6 }
  0x3d   : > { %1612 = sst [smem:[#allocation22_spill]] %s1384_s22  ;;  %s290_s17 = sshll.u32 %s282_s13, 4  ;;  %s1393_s17 = int_to_ptr.vmem [resolvable:$true] %s290_s17 }
  0x3e   : > { %s1404_s24 = scalar_lea.hbm %s1586_s1, %s858_s23  ;;  %s297_s25 = sand.u32 1, %s1225_s5  }
  0x3f   : > { %s279_s16 = scalar_lea.sflag [#allocation6], %s278_s14  ;;  %s1043_s30 = scalar_lea.hbm %s1390_s9, 128 }
  0x40   : > { %p1044_p0 = scmp.ne.s32.totalorder %s1390_s9, %s1043_s30  ;;  %p1045_p3 = pneg %p1397_p13 }
  0x41   : > { %s1048_s22 = scalar_lea.hbm %s1585_s0, 256  ;;  %p1049_p9 = scmp.lt.u32.totalorder %s1390_s9, %s1585_s0 }
  0x42   : > { %p1046_p5 = pnand %p1045_p3, %p1044_p0  ;;  %p1050_p1 = scmp.lt.u32.totalorder %s1048_s22, %s1043_s30 }
  0x43   : > { %p1052_p4 = scmp.lt.u32.totalorder %s1043_s30, %s1390_s9 }
  0x44   : > { %p1047_p7 = pneg %p1046_p5  ;;  %p1051_p2 = por %p1050_p1, %p1049_p9 }
  0x46   : > { %p1053_p6 = por %p1052_p4, %p1051_p2 }
  0x48   : > { %p1054_p8 = pnand %p1053_p6, %p1047_p7 }
  0x4a   : > { %1057 = shalt.err (!%p1054_p8)
}
  0x4b   : > { %s1058_s14 = scalar_lea.vmem %s1393_s17, 128  ;;  %s1230_s23 = smov [#allocation5]  }
  0x4c   : > { %p1059_p11 = scmp.ne.s32.totalorder %s1393_s17, %s1058_s14  ;;  %s1063_s18 = sshll.u32 %s1230_s23, 4  ;;  %s1064_s18 = int_to_ptr.vmem [resolvable:$false] %s1063_s18 }
  0x4d   : > { %s1065_s28 = scalar_lea.vmem %s1064_s18, 256  ;;  %p1066_p5 = scmp.lt.s32.totalorder %s1393_s17, %s1064_s18 }
  0x4e   : > { %p1061_p12 = pnand %p1059_p11, %p1045_p3  ;;  %p1067_p9 = scmp.lt.s32.totalorder %s1065_s28, %s1058_s14 }
  0x50   : > { %p1062_p0 = pneg %p1061_p12  ;;  %p1068_p1 = por %p1067_p9, %p1066_p5 }
  0x52   : > { %p1069_p2 = pnand %p1068_p1, %p1062_p0 }
  0x54   : > { %1072 = shalt.err (!%p1069_p2)
}
  0x55   : > { %935 = dma.hbm_to_vmem [thread:$0]  (!%p1397_p13), %s1390_s9, 128, %s1393_s17, %s279_s16  }
  0x56   : > { %s301_s30 = scalar_lea.vmem [#allocation8], %s1381_s21  ;;  %s298_s19 = scalar_lea.sflag [#allocation9], %s297_s25 }
  0x57   : > { %s309_s22 = sshll.u32 %s301_s30, 4  ;;  %s1073_s13 = scalar_lea.hbm %s1404_s24, 128  ;;  %s310_s22 = int_to_ptr.vmem [resolvable:$true] %s309_s22 }
  0x58   : > { %p1074_p7 = scmp.ne.s32.totalorder %s1404_s24, %s1073_s13  ;;  %s1078_s23 = scalar_lea.hbm %s1586_s1, 256 }
  0x59   : > { %p1079_p8 = scmp.lt.u32.totalorder %s1404_s24, %s1586_s1  ;;  %p1080_p11 = scmp.lt.u32.totalorder %s1078_s23, %s1073_s13 }
  0x5a   : > { %p1076_p4 = pnand %p1074_p7, %p1045_p3  ;;  %p1082_p0 = scmp.lt.u32.totalorder %s1073_s13, %s1404_s24 }
  0x5b   : > { %p1081_p12 = por %p1080_p11, %p1079_p8 }
  0x5c   : > { %p1077_p6 = pneg %p1076_p4 }
  0x5d   : > { %p1083_p5 = por %p1082_p0, %p1081_p12 }
  0x5f   : > { %p1084_p9 = pnand %p1083_p5, %p1077_p6 }
  0x61   : > { %1087 = shalt.err (!%p1084_p9)
}
  0x62   : > { %s1088_s16 = scalar_lea.vmem %s310_s22, 128  ;;  %s1231_s21 = smov [#allocation8]  }
  0x63   : > { %p1089_p1 = scmp.ne.s32.totalorder %s310_s22, %s1088_s16  ;;  %s1093_s9 = sshll.u32 %s1231_s21, 4  ;;  %s1094_s9 = int_to_ptr.vmem [resolvable:$false] %s1093_s9 }
  0x64   : > { %s1095_s17 = scalar_lea.vmem %s1094_s9, 256  ;;  %p1096_p4 = scmp.lt.s32.totalorder %s310_s22, %s1094_s9 }
  0x65   : > { %p1091_p2 = pnand %p1089_p1, %p1045_p3  ;;  %p1097_p10 = scmp.lt.s32.totalorder %s1095_s17, %s1088_s16 }
  0x67   : > { %p1092_p7 = pneg %p1091_p2  ;;  %p1098_p8 = por %p1097_p10, %p1096_p4 }
  0x69   : > { %p1099_p11 = pnand %p1098_p8, %p1092_p7 }
  0x6b   : > { %1102 = shalt.err (!%p1099_p11)
}
  0x6c   : > { %938 = dma.hbm_to_vmem [thread:$0]  (!%p1397_p13), %s1404_s24, 128, %s310_s22, %s298_s19  }
  0x6d   : > { %p1614_p6 = scmp.ne.s32.totalorder %s1605_s12, 0 }
  0x6e   : > { %s1457_s25 = sand.u32 (!%p1614_p6), 1, %s1209_s27   ;;  %p1615_p3 = scmp.ne.s32.totalorder (!%p1614_p6), %s1603_s10, 0 }
  0x6f   : > { %318 = sbr.rel (%p1614_p6) target bundleno = 929 (0x3a1), region = 44  ;;  %s862_s30 = sshll.u32 (!%p1614_p6), %s1457_s25, 3 }
  0x70   : > { %s321_s13 = scalar_lea.sflag (!%p1614_p6), [#allocation6], %s1457_s25  ;;  %s324_s2 = scalar_lea.vmem (!%p1614_p6), [#allocation5], %s862_s30 }
  0x76   : > { %1184 = dma.done.wait (%p1615_p3), %s321_s13, 128  }
  0x77   : > { %1186 = vsyncadd (%p1615_p3), %s321_s13, 4294967168  ;;  %s329_s20 = sand.u32 1, %s1312_s8   ;;  %s1466_s12 = scalar_lea.vmem [#allocation8], %s862_s30 }
  0x78   : > { %s330_s24 = scalar_lea.sflag [#allocation9], %s329_s20 }
  0x79   : > { %1188 = dma.done.wait (%p1615_p3), %s330_s24, 128  }
  0x7a   : > { %1190 = vsyncadd (%p1615_p3), %s330_s24, 4294967168  ;;  %p1616_p10 = scmp.eq.s32.totalorder %s1312_s8, 0 }
  0x7c   : > { %1192 = dma.done.wait (%p1616_p10), [#allocation9], 512   ;;  %p1617_p13 = pmov %p1616_p10 }
  0x7d   : > { %v1232_v1 = vmov 0.0|0.0   ;;  %vm1233_vm0 = vmmov 0   ;;  %v1234_v2 = vmov 0.0   ;;  %vm396_vm1 = vcmask 261120   ;;  %v385_v3 = vld [vmem:[#allocation10] sm:$0xff]  ;;  %v386_v4 = vld [vmem:[#allocation10 + $0x8] sm:$0xff] }
  0x7e   : > { %1194 = vsyncadd (%p1617_p13), [#allocation9], 4294966784  ;;  %908 = vmatprep.subr.bf16.mxu0 %v1232_v1  ;;  %895 = vmatprep.mubr.msk.f32.mxu0 %vm1233_vm0, %v1234_v2  ;;  %v909_v5 = vpack.c.bf16 %v386_v4, %v385_v3  ;;  %v387_v6 = vld [vmem:[#allocation10 + $0x10] sm:$0xff]  ;;  %v388_v7 = vld [vmem:[#allocation10 + $0x18] sm:$0xff]  ;;  %v1235_v11 = vmov 0   ;;  %vm380_vm3 = vcmask 0   ;;  %v490_v19 = vlaneseq }
  0x7f   : > { %898 = vmatprep.subr.mxu1 %v1234_v2  ;;  %900 = vmatprep.mubr.msk.f32.mxu1 %vm1233_vm0, %v1234_v2  ;;  %vm910_vm2 = vmpackc.low %vm396_vm1, %vm396_vm1  ;;  %v913_v8 = vpack.c.bf16 %v388_v7, %v387_v6  ;;  %v384_v9 = vld [vmem:[%s324_s2] sm:$0xff]  ;;  %v484_v10 = vld [vmem:[#allocation4] sm:$0x1]  ;;  %381 = vst.msk [vmem:[#allocation2] sm:$0x1] %vm380_vm3, %v1234_v2  ;;  %vm587_vm4 = vcmask 64512  }
  0x80   : > { %911 = vmatpush3.bf16.xpose.msk.msra.mxu0 %vm910_vm2, %v909_v5  ;;  %1005 = vset.pattern.permute.xlu0 %v1235_v11  ;;  %v865_v12 = vld [vmem:[%s1588_s3] ss:$0 sm:$0xff]  ;;  %v1492_v20 = vshrl.u32 %v490_v19, 7  ;;  %vm576_vm5 = vcmask 57344   ;;  %s375_s14 = scalar_lea.vmem [#allocation12], %s1457_s25  ;;  %vm382_vm6 = vcmask 253952  }
  0x81   : > { %912 = vmatprep.subr.bf16.mxu0 %v1232_v1  ;;  %1006 = vset.pattern.permute.xlu1 %v1235_v11  ;;  %v483_v17 = vld [vmem:[%s1589_s4] sm:$0x1]  ;;  %383 = vst.msk [vmem:[#allocation3] sm:$0x1] %vm382_vm6, %v1234_v2  ;;  %s874_s23 = sshll.u32 %s1217_s29, 4  ;;  %s715_s21 = sshll.u32 %s375_s14, 4  ;;  %s716_s21 = int_to_ptr.vmem [resolvable:$true] %s715_s21 }
  0x82   : > { %487 = vperm.xlu0 %1005, %v484_v10   ;;  %v585_v18 = vld [vmem:[%s1466_s12] sm:$0xff]  ;;  %v492_v21 = vsub.s32 0, %v1492_v20  ;;  %s1506_s16 = scalar_lea.hbm %s1592_s7, %s874_s23  ;;  %s689_s9 = scalar_lea.sflag [#allocation13], %s1457_s25 }
  0x83   : > { %s1103_s17 = scalar_lea.vmem %s716_s21, 16  ;;  %p1618_p0 = scmp.ne.s32.totalorder %s1611_s15, 0 }
  0x84   : > { %p1104_p12 = scmp.ne.s32.totalorder %s716_s21, %s1103_s17  ;;  %s1236_s30 = smov [#allocation12]  }
  0x85   : > { %s1107_s13 = sshll.u32 %s1236_s30, 4  ;;  %s1108_s13 = int_to_ptr.vmem [resolvable:$false] %s1107_s13 }
  0x86   : > { %v578_v33 = vld [vmem:[#allocation2] sm:$0x1]  ;;  %p1105_p5 = pnand %p1104_p12, %p1618_p0  ;;  %s1109_s2 = scalar_lea.vmem %s1108_s13, 32 }
  0x87   : > { %p1110_p1 = scmp.lt.s32.totalorder %s716_s21, %s1108_s13  ;;  %p1111_p2 = scmp.lt.s32.totalorder %s1109_s2, %s1103_s17 }
  0x88   : > { %915 = vmatpush3.bf16.xpose.msk.msra.mxu0 %vm910_vm2, %v913_v8  ;;  %p1106_p9 = pneg %p1105_p5 }
  0x89   : > { %p1112_p7 = por %p1111_p2, %p1110_p1 }
  0x8b   : > { %p1113_p4 = pnand %p1112_p7, %p1106_p9 }
  0x8f   : > { %896 = vmatmul.mubr.msk.f32.vlgmr.msra.gmra.mrb[0].mxu0 %vm396_vm1, %v384_v9 }
 0x101   : > { %v488_v22 = vpop.permute.xlu0 %487 }
 0x102   : > { %v493_v23 = vrot.slane %v488_v22, %v492_v21 }
 0x162   : > { %v478_v13 = vpop.f32.mrb[0].mxu0 }
 0x163   : > { %v479_v14 = vadd.f32 %v865_v12, %v478_v13  ;;  %v897_v15 = vpop.f32.mrb[1].mxu0 }
 0x165   : > { %1007 = vtanh.f32 %v479_v14 }
 0x16f   : > { %v1008_v16 = vpop.eup %1007 }
 0x170   : > { %899 = vmatpush3.xpose.msk.msra.mxu1 %vm396_vm1, %v1008_v16 }
 0x171   : > { %903 = vmatprep.subr.mxu1 %v1234_v2 }
 0x173   : > { %901 = vmatmul.mubr.msk.f32.vlgmr.msra.gmra.mrb[0].mxu1 %vm396_vm1, %v483_v17 }
 0x174   : > { %905 = vmatprep.mubr.msk.f32.mxu1 %vm1233_vm0, %v1234_v2  ;;  %904 = vmatpush3.msra.mxu1 %v585_v18 }
 0x246   : > { %v566_v24 = vpop.f32.mrb[0].mxu1 }
 0x247   : > { %v567_v25 = vadd.f32 %v566_v24, %v493_v23  ;;  %v902_v26 = vpop.f32.mrb[1].mxu1 }
 0x249   : > { %v570_v27 = vsub.f32 0.0, %v567_v25 }
 0x24b   : > { %v571_v28 = vmul.f32 1.442695, %v570_v27 }
 0x24d   : > { %1009 = vpow2.f32 %v571_v28 }
 0x257   : > { %v1010_v29 = vpop.eup %1009 }
 0x258   : > { %v573_v30 = vadd.f32 1.0, %v1010_v29 }
 0x25a   : > { %1011 = vrcp.f32 %v573_v30 }
 0x264   : > { %v1012_v31 = vpop.eup %1011 }
 0x265   : > { %906 = vmatmul.mubr.msk.f32.vlgmr.msra.gmra.mrb[2].mxu1 %vm587_vm4, %v1012_v31  ;;  %v579_v32 = vsel %vm576_vm5, %v1012_v31, 0.0  ;;  %577 = vst.msk [vmem:[%s375_s14] sm:$0x1] %vm576_vm5, %v1012_v31 }
 0x266   : > { %580 = vadd.xlane.f32.xlu0 %v579_v32 }
 0x2f3   : > { %v581_v34 = vpop.xlane.xlu0 %580 }
 0x2f4   : > { %v582_v35 = vadd.f32 %v581_v34, %v578_v33 }
 0x2f6   : > { %584 = vst.msk [vmem:[#allocation2] sm:$0x1] %vm380_vm3, %v582_v35 }
 0x2fd   : > { %v667_v36 = vld [vmem:[#allocation2] sm:$0x1] }
 0x2fe   : > { %1013 = vrcp.f32 %v667_v36 }
 0x308   : > { %v1014_v37 = vpop.eup %1013 }
 0x309   : > { %v669_v38 = vmul.f32 %v1014_v37, %v667_v36 }
 0x30b   : > { %v670_v39 = vsub.f32 2.0, %v669_v38 }
 0x30d   : > { %v671_v40 = vmul.f32 %v1014_v37, %v670_v39 }
 0x30f   : > { %675 = vperm.xlu1 %1006, %v671_v40  }
 0x310   : > { %1116 = shalt.err (!%p1113_p4)
}
 0x311   : > { %s1117_s20 = scalar_lea.hbm %s1506_s16, 16  ;;  %s1121_s8 = scalar_lea.hbm %s1592_s7, 32 }
 0x312   : > { %p1118_p8 = scmp.ne.s32.totalorder %s1506_s16, %s1117_s20  ;;  %p1122_p3 = scmp.lt.u32.totalorder %s1506_s16, %s1592_s7 }
 0x313   : > { %p1123_p10 = scmp.lt.u32.totalorder %s1121_s8, %s1117_s20  ;;  %p1125_p12 = scmp.lt.u32.totalorder %s1117_s20, %s1506_s16 }
 0x314   : > { %p1119_p11 = pnand %p1118_p8, %p1618_p0 }
 0x315   : > { %p1124_p13 = por %p1123_p10, %p1122_p3 }
 0x316   : > { %p1120_p6 = pneg %p1119_p11 }
 0x317   : > { %p1126_p5 = por %p1125_p12, %p1124_p13 }
 0x319   : > { %p1127_p9 = pnand %p1126_p5, %p1120_p6 }
 0x31b   : > { %1130 = shalt.err (!%p1127_p9)
}
 0x31c   : > { %925 = dma.vmem_to_hbm [thread:$0]  (%p1618_p0), %s716_s21, 16, %s1506_s16, %s689_s9   ;;  %v586_v41 = vld [vmem:[#allocation3] sm:$0x1] }
 0x31d   : > { %s369_s19 = scalar_lea.vmem [#allocation11], %s1457_s25  ;;  %s1535_s16 = scalar_lea.hbm %s1591_s6, %s874_s23 }
 0x31e   : > { %s701_s14 = sshll.u32 %s369_s19, 4  ;;  %s685_s21 = scalar_lea.sflag [#allocation7], %s1457_s25  ;;  %s1537_s14 = int_to_ptr.vmem [resolvable:$true] %s701_s14 }
 0x31f   : > { %s1131_s9 = scalar_lea.vmem %s1537_s14, 16  ;;  %s1237_s17 = smov [#allocation11]  }
 0x320   : > { %p1132_p1 = scmp.ne.s32.totalorder %s1537_s14, %s1131_s9  ;;  %s1135_s29 = sshll.u32 %s1237_s17, 4  ;;  %s1136_s29 = int_to_ptr.vmem [resolvable:$false] %s1135_s29 }
 0x321   : > { %s1137_s30 = scalar_lea.vmem %s1136_s29, 32  ;;  %p1138_p4 = scmp.lt.s32.totalorder %s1537_s14, %s1136_s29 }
 0x322   : > { %p1133_p2 = pnand %p1132_p1, %p1618_p0  ;;  %p1139_p8 = scmp.lt.s32.totalorder %s1137_s30, %s1131_s9 }
 0x324   : > { %p1134_p7 = pneg %p1133_p2  ;;  %p1140_p11 = por %p1139_p8, %p1138_p4 }
 0x326   : > { %p1141_p6 = pnand %p1140_p11, %p1134_p7 }
 0x338   : > { %v657_v42 = vpop.f32.mrb[2].mxu1 }
 0x339   : > { %v661_v43 = vadd.f32 %v657_v42, %v586_v41  ;;  %v907_v44 = vpop.f32.mrb[3].mxu1 }
 0x33b   : > { %663 = vst.msk [vmem:[#allocation3] sm:$0x1] %vm382_vm6, %v661_v43 }
 0x342   : > { %v672_v47 = vld [vmem:[#allocation3] sm:$0x1] }
 0x38e   : > { %v676_v45 = vpop.permute.xlu1 %675 }
 0x38f   : > { %v681_v46 = vrot.slane %v676_v45, %v492_v21 }
 0x391   : > { %v682_v48 = vmul.f32 %v681_v46, %v672_v47 }
 0x393   : > { %683 = vst.msk [vmem:[%s369_s19] sm:$0x1] %vm382_vm6, %v682_v48 }
 0x394   : > { %1144 = shalt.err (!%p1141_p6)
}
 0x395   : > { %s1145_s25 = scalar_lea.hbm %s1535_s16, 16  ;;  %s1149_s2 = scalar_lea.hbm %s1591_s6, 32 }
 0x396   : > { %p1146_p3 = scmp.ne.s32.totalorder %s1535_s16, %s1145_s25  ;;  %p1150_p12 = scmp.lt.u32.totalorder %s1535_s16, %s1591_s6 }
 0x397   : > { %p1151_p5 = scmp.lt.u32.totalorder %s1149_s2, %s1145_s25  ;;  %p1153_p1 = scmp.lt.u32.totalorder %s1145_s25, %s1535_s16 }
 0x398   : > { %p1147_p10 = pnand %p1146_p3, %p1618_p0 }
 0x399   : > { %p1152_p9 = por %p1151_p5, %p1150_p12 }
 0x39a   : > { %p1148_p13 = pneg %p1147_p10 }
 0x39b   : > { %p1154_p2 = por %p1153_p1, %p1152_p9 }
 0x39d   : > { %p1155_p7 = pnand %p1154_p2, %p1148_p13 }
 0x39f   : > { %1158 = shalt.err (!%p1155_p7)
}
 0x3a0   : > { %924 = dma.vmem_to_hbm [thread:$0]  (%p1618_p0), %s1537_s14, 16, %s1535_s16, %s685_s21  }
 0x3a1 PF: > { %s727_s12 = sand.u32 1, %s1205_s26   ;;  %p1619_p4 = scmp.ne.s32.totalorder %s1604_s11, 0 }
 0x3a2   : > { %p1620_p8 = scmp.ge.s32.totalorder %s1225_s5, 2  ;;  %s728_s8 = scalar_lea.sflag [#allocation7], %s727_s12 }
 0x3a4   : > { %p940_p11 = pnand %p1620_p8, %p1619_p4 }
 0x3a6   : > { %1196 = dma.done.wait (!%p940_p11), %s728_s8, 16  }
 0x3a7   : > { %1198 = vsyncadd (!%p940_p11), %s728_s8, 4294967280  ;;  %s736_s10 = scalar_lea.sflag [#allocation13], %s727_s12 }
 0x3a8   : > { %1200 = dma.done.wait (!%p940_p11), %s736_s10, 16  }
 0x3a9   : > { %1202 = vsyncadd (!%p940_p11), %s736_s10, 4294967280  ;;  %s32_s5 = sadd.s32 1, %s1225_s5   ;;  %s1621_s15 = sld [smem:[#allocation19_spill]] }
 0x3aa   : > { %p29_p6 = scmp.ge.s32.totalorder %s32_s5, 4   ;;  %s1622_s28 = sld [smem:[#allocation22_spill]] }
 0x3ab   : > { %s1623_s29 = sld [smem:[#allocation20_spill]]  ;;  %s1624_s30 = sld [smem:[#allocation21_spill]] }
 0x3ac   : > { %s1625_s26 = smov %s1209_s27  ;;  %31 = sbr.rel (!%p29_p6) target bundleno = 13 (0xd), region = 131 }
 0x3af   : > { %s1626_s27 = smov %s1621_s15 }
 0x3b3   :  { %740 = vsyncpa [#allocation6], 1 }
 0x3b4   :  { %742 = vsyncpa [#allocation6 + $0x1], 1 }
 0x3b5   :  { %743 = vsyncpa [#allocation9], 1 }
 0x3b6   :  { %745 = vsyncpa [#allocation9 + $0x1], 1 }
 0x3b7   :  { %746 = vsyncpa [#allocation7], 1 }
 0x3b8   :  { %748 = vsyncpa [#allocation7 + $0x1], 1 }
 0x3b9   :  { %749 = vsyncpa [#allocation13], 1 }
 0x3ba   :  { %751 = vsyncpa [#allocation13 + $0x1], 1 }

</bundles_post_ra>
